<compile_context>
chip_gen: v6e
topology: v6e:2x2x1
jax: 0.10.0
libtpu: 0.0.40
codegen_flags: <defaults>
</compile_context>

<pallas_src>
import numpy as np
import jax
import jax.numpy as jnp
from jax.experimental import pallas as pl
from jax.experimental.pallas import tpu as pltpu

K = 5          # kernel size (must be odd)
N_GROUPS = 3   # channel groups for the causal center-pixel mask
HALO = 8       # leading zero rows in the padded scratch (multiple of 8, >= K//2)


def _cdiv(a, b):
    return -(-a // b)


def make_causal_mask(dim, k=K, n_groups=N_GROUPS):
    """Replicates CausalConv.mask construction (OIHW layout)."""
    c = k // 2
    mask = np.ones((dim, dim, k, k), dtype=np.float32)
    mask[:, :, c + 1:, :] = 0.0          # rows strictly below center
    mask[:, :, c, c + 1:] = 0.0          # right of center in center row
    for i in range(n_groups):
        for j in range(i, n_groups):
            mask[j::n_groups, i::n_groups, c, c] = 0.0
    return mask


def fold_conv_weights(w_oihw, mask_oihw, width, lane_groups):
    """(O,I,K,K) raw weights -> (K//2+1, G*W*I, G*W*O) causally-masked,
    Toeplitz-folded, block-diagonal weights for the lane-dense (rows, G*W*C)
    layout.

    Base fold: Wb[kh, xw*I + ci, w*O + co] = (w*mask)[co, ci, kh, xw - w + K//2]
    when 0 <= xw - w + K//2 < K, else 0 (absorbing the 'same' zero padding
    along W). Only live rows kh <= K//2 are kept (13 of 25 taps). The G lane
    groups (packed images) get independent diagonal blocks so they never mix."""
    O, I, Kk, _ = w_oihw.shape
    P = Kk // 2
    wm = np.asarray(w_oihw, np.float32) * mask_oihw       # apply causal mask
    kw_idx = np.arange(Kk)[:, None, None]
    xw_idx = np.arange(width)[None, :, None]
    w_idx = np.arange(width)[None, None, :]
    sel = (xw_idx == w_idx + kw_idx - P).astype(np.float32)   # (K, W, W)
    folded = np.einsum('oikl,lxw->kxiwo', wm, sel)[:P + 1]    # (P+1, W, I, W, O)
    folded = folded.reshape(P + 1, width * I, width * O)
    eye = np.eye(lane_groups, dtype=np.float32)
    big = np.einsum('gh,kab->kgahb', eye, folded)             # block-diagonal
    big = big.reshape(P + 1, lane_groups * width * I, lane_groups * width * O)
    return jnp.asarray(big, jnp.float32)


def make_resblock_kernel(bp, h, s, p, lanes):
    """Kernel closure. bp: lane-packed pairs per grid step; h: image height;
    s: per-pair row stride (h + zero tail, multiple of 8); p: K//2; lanes: G*W*C."""
    m = bp * s
    tail = s - h              # >= p, so each pair's tail is the next one's halo

    def kernel(x_ref, w1_ref, b1_ref, w2_ref, b2_ref, o_ref, pad_ref):
        # x_ref, o_ref: (bp, h, lanes)   lane-packed, batch-blocked activations
        # wX_ref:       (p+1, lanes, lanes)  folded block-diagonal weights
        # bX_ref:       (1, lanes)
        # pad_ref:      (HALO + bp*s, lanes) stacked scratch (rows = M axis)
        zero_tail = jnp.zeros((bp, tail, lanes), jnp.float32)

        def write_acts(act):
            # One aligned, lane-dense store: each pair's h rows followed by a
            # zero tail (which is also the bottom->top halo between pairs).
            v = jnp.concatenate([act, zero_tail], axis=1).reshape(m, lanes)
            pad_ref[HALO:HALO + m, :] = v

        def conv(w_ref, b_ref):
            # 3 big MXU dots over all stacked pairs; contraction width = lanes.
            acc = jnp.dot(pad_ref[HALO - p:HALO - p + m, :], w_ref[0],
                          preferred_element_type=jnp.float32)
            for kh in range(1, p + 1):
                acc = acc + jnp.dot(
                    pad_ref[HALO - p + kh:HALO - p + kh + m, :], w_ref[kh],
                    preferred_element_type=jnp.float32)
            # Keep only the h valid rows per pair; add bias once (no
            # broadcast_to accumulator init).
            valid = acc.reshape(bp, s, lanes)[:, :h, :]
            return valid + b_ref[...].reshape(1, 1, lanes)

        # Top halo for the first pair. Kept per-step (8 rows, ~2 vreg stores)
        # so v7x megacore sharding never sees an uninitialized halo.
        pad_ref[0:HALO, :] = jnp.zeros((HALO, lanes), jnp.float32)

        x = x_ref[...]
        write_acts(jnp.maximum(x, 0.0))          # conv1(relu(x))
        h1 = conv(w1_ref, b1_ref)
        write_acts(jnp.maximum(h1, 0.0))         # conv2(relu(h1))
        h2 = conv(w2_ref, b2_ref)
        o_ref[...] = x + 0.5 * h2                # residual

    return kernel


def causal_res_block(x_nchw, w1_oihw, b1, w2_oihw, b2,
                     n_groups=N_GROUPS, target_images_per_step=64):
    """Forward pass of CausalResBlock. Takes raw NCHW input and raw OIHW
    weights; the causal mask is applied here (not trusted to the caller)."""
    N, C, H, W = x_nchw.shape
    Kk = w1_oihw.shape[-1]
    assert Kk % 2 == 1
    P = Kk // 2
    assert P <= HALO
    WC = W * C

    # Lane packing factor: pack G images side by side so the lane dim is a
    # full 128-lane vreg (unmasked stores, MXU-native contraction width).
    G = 128 // WC if (WC < 128 and 128 % WC == 0) else 1
    L = G * WC

    mask = make_causal_mask(C, Kk, n_groups)
    w1f = fold_conv_weights(w1_oihw, mask, W, G)      # (P+1, L, L)
    w2f = fold_conv_weights(w2_oihw, mask, W, G)
    b1f = jnp.asarray(np.tile(np.asarray(b1, np.float32), G * W).reshape(1, L))
    b2f = jnp.asarray(np.tile(np.asarray(b2, np.float32), G * W).reshape(1, L))

    # Batch blocking: bp lane-packed pairs (= G*bp images) per grid step.
    # Keep >=2 grid steps when possible so v7x can shard the batch over both
    # TensorCores (no-op on v5e/v6e).
    n_pairs = _cdiv(N, G)
    bp = min(max(1, target_images_per_step // G), n_pairs)
    if n_pairs > 1 and n_pairs // bp < 2:
        bp = _cdiv(n_pairs, 2)
    n_pairs_pad = _cdiv(n_pairs, bp) * bp
    n_img_pad = n_pairs_pad * G

    # NCHW -> lane-dense folded layout (pairs, H, G*W*C), zero-padding the
    # batch to a whole number of blocks (padded images are discarded below).
    # TODO(synk): when stacking CausalResBlocks, keep activations in this
    # folded layout between blocks and only convert at the model boundary.
    x_nhwc = jnp.transpose(x_nchw, (0, 2, 3, 1)).astype(jnp.float32)
    if n_img_pad != N:
        x_nhwc = jnp.concatenate(
            [x_nhwc, jnp.zeros((n_img_pad - N, H, W, C), jnp.float32)], axis=0)
    x_fold = (x_nhwc.reshape(n_pairs_pad, G, H, W, C)
              .transpose(0, 2, 1, 3, 4)
              .reshape(n_pairs_pad, H, L))

    # Per-pair row stride inside the stacked scratch: H activation rows plus a
    # zero tail, rounded so S is a multiple of 8 (aligned stores / reshapes).
    S = _cdiv(H + P, 8) * 8
    kernel = make_resblock_kernel(bp, H, S, P, L)

    out = pl.pallas_call(
        kernel,
        out_shape=jax.ShapeDtypeStruct((n_pairs_pad, H, L), jnp.float32),
        grid_spec=pltpu.PrefetchScalarGridSpec(
            num_scalar_prefetch=0,
            grid=(n_pairs_pad // bp,),
            in_specs=[
                pl.BlockSpec((bp, H, L), lambda i: (i, 0, 0)),       # x
                pl.BlockSpec((P + 1, L, L), lambda i: (0, 0, 0)),    # w1
                pl.BlockSpec((1, L), lambda i: (0, 0)),              # b1
                pl.BlockSpec((P + 1, L, L), lambda i: (0, 0, 0)),    # w2
                pl.BlockSpec((1, L), lambda i: (0, 0)),              # b2
            ],
            out_specs=pl.BlockSpec((bp, H, L), lambda i: (i, 0, 0)),
            scratch_shapes=[pltpu.VMEM((HALO + bp * S, L), jnp.float32)],
        ),
        compiler_params=pltpu.CompilerParams(
            dimension_semantics=("parallel",)),
    )(x_fold, w1f, b1f, w2f, b2f)

    # folded -> NCHW (boundary-only plumbing), dropping padded images.
    out_nhwc = (out.reshape(n_pairs_pad, H, G, W, C)
                .transpose(0, 2, 1, 3, 4)
                .reshape(n_img_pad, H, W, C))[:N]
    return jnp.transpose(out_nhwc, (0, 3, 1, 2))


def numpy_reference(x_nchw, w1_oihw, b1, w2_oihw, b2, n_groups=N_GROUPS):
    """Straight float64 port of the PyTorch module (NCHW / OIHW)."""
    x = np.asarray(x_nchw, np.float64)
    Kk = np.asarray(w1_oihw).shape[-1]
    mask = make_causal_mask(x.shape[1], Kk, n_groups).astype(np.float64)
    w1 = np.asarray(w1_oihw, np.float64) * mask
    w2 = np.asarray(w2_oihw, np.float64) * mask
    P = Kk // 2
    N, C, H, W = x.shape

    def conv(a, w, b):
        ap = np.pad(a, ((0, 0), (0, 0), (P, P), (P, P)))
        out = np.zeros((N, w.shape[0], H, W)) + np.asarray(b, np.float64).reshape(1, -1, 1, 1)
        for kh in range(Kk):
            for kw in range(Kk):
                out += np.einsum('nchw,oc->nohw',
                                 ap[:, :, kh:kh + H, kw:kw + W], w[:, :, kh, kw])
        return out

    h = conv(np.maximum(x, 0.0), w1, b1)
    h = conv(np.maximum(h, 0.0), w2, b2)
    return x + 0.5 * h


if __name__ == "__main__":
    dim, N, H, W = 4, 2, 16, 16

    key = jax.random.PRNGKey(0)
    k1, k2, kb1, kb2, kx = jax.random.split(key, 5)

    # Parameter init matching the module: weight ~ randn(O,I,K,K)/sqrt(K*K*dim);
    # biases made nonzero here to exercise the bias path.
    scale = 1.0 / float(np.sqrt(K * K * dim))
    w1 = jax.random.normal(k1, (dim, dim, K, K), jnp.float32) * scale
    w2 = jax.random.normal(k2, (dim, dim, K, K), jnp.float32) * scale
    b1 = jax.random.normal(kb1, (dim,), jnp.float32) * 0.1
    b2 = jax.random.normal(kb2, (dim,), jnp.float32) * 0.1

    x = jax.random.normal(kx, (N, dim, H, W), jnp.float32)   # NCHW, like PyTorch

    out = jax.block_until_ready(causal_res_block(x, w1, b1, w2, b2))
    ref = numpy_reference(x, w1, b1, w2, b2)
    assert out.shape == x.shape
    assert np.allclose(np.asarray(out), ref, atol=1e-3, rtol=1e-3), "mismatch vs reference"

    # Second check: exercises batch blocking (grid > 1), multi-pair M-stacking
    # (bp > 1) and the zero-padded batch remainder path.
    N2 = 6
    x2 = jax.random.normal(jax.random.PRNGKey(1), (N2, dim, H, W), jnp.float32)
    out2 = jax.block_until_ready(causal_res_block(x2, w1, b1, w2, b2))
    ref2 = numpy_reference(x2, w1, b1, w2, b2)
    assert out2.shape == x2.shape
    assert np.allclose(np.asarray(out2), ref2, atol=1e-3, rtol=1e-3), "mismatch vs reference (batched)"

    print("KERNEL_OK")
</pallas_src>

<mosaic_0001>
module attributes {stable_mosaic.version = 11 : i64} {
  func.func @kernel(%arg0: i32, %arg1: memref<1x16x128xf32, #tpu.memory_space<vmem>>, %arg2: memref<3x128x128xf32, #tpu.memory_space<vmem>>, %arg3: memref<1x128xf32, #tpu.memory_space<vmem>>, %arg4: memref<3x128x128xf32, #tpu.memory_space<vmem>>, %arg5: memref<1x128xf32, #tpu.memory_space<vmem>>, %arg6: memref<1x16x128xf32, #tpu.memory_space<vmem>>, %arg7: memref<32x128xf32, #tpu.memory_space<vmem>>) attributes {dimension_semantics = [#tpu.dimension_semantics<parallel>], iteration_bounds = array<i64: 1>, scalar_prefetch = 0 : i64, scratch_operands = 1 : i64, tpu.core_type = #tpu.core_type<tc>, window_params = [{transform_indices = @transform_0, window_bounds = array<i64: 1, 16, 128>}, {pipeline_mode = #tpu.pipeline_mode<synchronous>, transform_indices = @transform_1, window_bounds = array<i64: 3, 128, 128>}, {pipeline_mode = #tpu.pipeline_mode<synchronous>, transform_indices = @transform_2, window_bounds = array<i64: 1, 128>}, {pipeline_mode = #tpu.pipeline_mode<synchronous>, transform_indices = @transform_3, window_bounds = array<i64: 3, 128, 128>}, {pipeline_mode = #tpu.pipeline_mode<synchronous>, transform_indices = @transform_4, window_bounds = array<i64: 1, 128>}, {transform_indices = @transform_5, window_bounds = array<i64: 1, 16, 128>}]} {
    %cst = arith.constant 0.000000e+00 : f32
    %0 = vector.broadcast %cst : f32 to vector<1x8x128xf32>
    %cst_0 = arith.constant 0.000000e+00 : f32
    %1 = vector.broadcast %cst_0 : f32 to vector<8x128xf32>
    %c0 = arith.constant 0 : index
    %c0_1 = arith.constant 0 : index
    %2 = vector.load %arg7[%c0, %c0_1] : memref<32x128xf32, #tpu.memory_space<vmem>>, vector<8x128xf32>
    tpu.vector_store %arg7[%c0, %c0_1], %1 {strides = array<i32>} : memref<32x128xf32, #tpu.memory_space<vmem>>, vector<8x128xf32>,
    %c0_2 = arith.constant 0 : index
    %c0_3 = arith.constant 0 : index
    %c0_4 = arith.constant 0 : index
    %3 = vector.load %arg1[%c0_2, %c0_3, %c0_4] : memref<1x16x128xf32, #tpu.memory_space<vmem>>, vector<1x16x128xf32>
    %cst_5 = arith.constant 0.000000e+00 : f32
    %4 = vector.broadcast %cst_5 : f32 to vector<1x16x128xf32>
    %5 = arith.maximumf %3, %4 : vector<1x16x128xf32>
    %6 = tpu.concatenate %5, %0 in 1 : vector<1x16x128xf32>, vector<1x8x128xf32> -> vector<1x24x128xf32>
    %7 = vector.shape_cast %6 : vector<1x24x128xf32> to vector<24x128xf32>
    %c8 = arith.constant 8 : index
    %c0_6 = arith.constant 0 : index
    %8 = vector.load %arg7[%c8, %c0_6] : memref<32x128xf32, #tpu.memory_space<vmem>>, vector<24x128xf32>
    tpu.vector_store %arg7[%c8, %c0_6], %7 {strides = array<i32>} : memref<32x128xf32, #tpu.memory_space<vmem>>, vector<24x128xf32>,
    %c6 = arith.constant 6 : index
    %c0_7 = arith.constant 0 : index
    %9 = vector.load %arg7[%c6, %c0_7] : memref<32x128xf32, #tpu.memory_space<vmem>>, vector<24x128xf32>
    %c0_8 = arith.constant 0 : index
    %c0_9 = arith.constant 0 : index
    %c0_10 = arith.constant 0 : index
    %10 = vector.load %arg2[%c0_8, %c0_9, %c0_10] : memref<3x128x128xf32, #tpu.memory_space<vmem>>, vector<1x128x128xf32>
    %11 = vector.shape_cast %10 : vector<1x128x128xf32> to vector<128x128xf32>
    %cst_11 = arith.constant dense<0.000000e+00> : vector<24x128xf32>
    %12 = tpu.matmul %9, %11, %cst_11 {dimension_numbers = #tpu.dot_dimension_numbers<[1], [0], [0], [1], [0, 0, 1, 1], [], []>} : vector<24x128xf32>, vector<128x128xf32>, vector<24x128xf32> -> vector<24x128xf32>
    %c7 = arith.constant 7 : index
    %c0_12 = arith.constant 0 : index
    %13 = vector.load %arg7[%c7, %c0_12] : memref<32x128xf32, #tpu.memory_space<vmem>>, vector<24x128xf32>
    %c1 = arith.constant 1 : index
    %c0_13 = arith.constant 0 : index
    %c0_14 = arith.constant 0 : index
    %14 = vector.load %arg2[%c1, %c0_13, %c0_14] : memref<3x128x128xf32, #tpu.memory_space<vmem>>, vector<1x128x128xf32>
    %15 = vector.shape_cast %14 : vector<1x128x128xf32> to vector<128x128xf32>
    %cst_15 = arith.constant dense<0.000000e+00> : vector<24x128xf32>
    %16 = tpu.matmul %13, %15, %cst_15 {dimension_numbers = #tpu.dot_dimension_numbers<[1], [0], [0], [1], [0, 0, 1, 1], [], []>} : vector<24x128xf32>, vector<128x128xf32>, vector<24x128xf32> -> vector<24x128xf32>
    %17 = arith.addf %12, %16 : vector<24x128xf32>
    %c8_16 = arith.constant 8 : index
    %c0_17 = arith.constant 0 : index
    %18 = vector.load %arg7[%c8_16, %c0_17] : memref<32x128xf32, #tpu.memory_space<vmem>>, vector<24x128xf32>
    %c2 = arith.constant 2 : index
    %c0_18 = arith.constant 0 : index
    %c0_19 = arith.constant 0 : index
    %19 = vector.load %arg2[%c2, %c0_18, %c0_19] : memref<3x128x128xf32, #tpu.memory_space<vmem>>, vector<1x128x128xf32>
    %20 = vector.shape_cast %19 : vector<1x128x128xf32> to vector<128x128xf32>
    %cst_20 = arith.constant dense<0.000000e+00> : vector<24x128xf32>
    %21 = tpu.matmul %18, %20, %cst_20 {dimension_numbers = #tpu.dot_dimension_numbers<[1], [0], [0], [1], [0, 0, 1, 1], [], []>} : vector<24x128xf32>, vector<128x128xf32>, vector<24x128xf32> -> vector<24x128xf32>
    %22 = arith.addf %17, %21 : vector<24x128xf32>
    %23 = vector.shape_cast %22 : vector<24x128xf32> to vector<1x24x128xf32>
    %24 = vector.extract_strided_slice %23 {offsets = [0, 0, 0], sizes = [1, 16, 128], strides = [1, 1, 1]} : vector<1x24x128xf32> to vector<1x16x128xf32>
    %c0_21 = arith.constant 0 : index
    %c0_22 = arith.constant 0 : index
    %25 = vector.load %arg3[%c0_21, %c0_22] : memref<1x128xf32, #tpu.memory_space<vmem>>, vector<1x128xf32>
    %26 = vector.shape_cast %25 : vector<1x128xf32> to vector<1x1x128xf32>
    %27 = vector.broadcast %26 : vector<1x1x128xf32> to vector<1x16x128xf32>
    %28 = arith.addf %24, %27 : vector<1x16x128xf32>
    %cst_23 = arith.constant 0.000000e+00 : f32
    %29 = vector.broadcast %cst_23 : f32 to vector<1x16x128xf32>
    %30 = arith.maximumf %28, %29 : vector<1x16x128xf32>
    %31 = tpu.concatenate %30, %0 in 1 : vector<1x16x128xf32>, vector<1x8x128xf32> -> vector<1x24x128xf32>
    %32 = vector.shape_cast %31 : vector<1x24x128xf32> to vector<24x128xf32>
    %c8_24 = arith.constant 8 : index
    %c0_25 = arith.constant 0 : index
    %33 = vector.load %arg7[%c8_24, %c0_25] : memref<32x128xf32, #tpu.memory_space<vmem>>, vector<24x128xf32>
    tpu.vector_store %arg7[%c8_24, %c0_25], %32 {strides = array<i32>} : memref<32x128xf32, #tpu.memory_space<vmem>>, vector<24x128xf32>,
    %c6_26 = arith.constant 6 : index
    %c0_27 = arith.constant 0 : index
    %34 = vector.load %arg7[%c6_26, %c0_27] : memref<32x128xf32, #tpu.memory_space<vmem>>, vector<24x128xf32>
    %c0_28 = arith.constant 0 : index
    %c0_29 = arith.constant 0 : index
    %c0_30 = arith.constant 0 : index
    %35 = vector.load %arg4[%c0_28, %c0_29, %c0_30] : memref<3x128x128xf32, #tpu.memory_space<vmem>>, vector<1x128x128xf32>
    %36 = vector.shape_cast %35 : vector<1x128x128xf32> to vector<128x128xf32>
    %cst_31 = arith.constant dense<0.000000e+00> : vector<24x128xf32>
    %37 = tpu.matmul %34, %36, %cst_31 {dimension_numbers = #tpu.dot_dimension_numbers<[1], [0], [0], [1], [0, 0, 1, 1], [], []>} : vector<24x128xf32>, vector<128x128xf32>, vector<24x128xf32> -> vector<24x128xf32>
    %c7_32 = arith.constant 7 : index
    %c0_33 = arith.constant 0 : index
    %38 = vector.load %arg7[%c7_32, %c0_33] : memref<32x128xf32, #tpu.memory_space<vmem>>, vector<24x128xf32>
    %c1_34 = arith.constant 1 : index
    %c0_35 = arith.constant 0 : index
    %c0_36 = arith.constant 0 : index
    %39 = vector.load %arg4[%c1_34, %c0_35, %c0_36] : memref<3x128x128xf32, #tpu.memory_space<vmem>>, vector<1x128x128xf32>
    %40 = vector.shape_cast %39 : vector<1x128x128xf32> to vector<128x128xf32>
    %cst_37 = arith.constant dense<0.000000e+00> : vector<24x128xf32>
    %41 = tpu.matmul %38, %40, %cst_37 {dimension_numbers = #tpu.dot_dimension_numbers<[1], [0], [0], [1], [0, 0, 1, 1], [], []>} : vector<24x128xf32>, vector<128x128xf32>, vector<24x128xf32> -> vector<24x128xf32>
    %42 = arith.addf %37, %41 : vector<24x128xf32>
    %c8_38 = arith.constant 8 : index
    %c0_39 = arith.constant 0 : index
    %43 = vector.load %arg7[%c8_38, %c0_39] : memref<32x128xf32, #tpu.memory_space<vmem>>, vector<24x128xf32>
    %c2_40 = arith.constant 2 : index
    %c0_41 = arith.constant 0 : index
    %c0_42 = arith.constant 0 : index
    %44 = vector.load %arg4[%c2_40, %c0_41, %c0_42] : memref<3x128x128xf32, #tpu.memory_space<vmem>>, vector<1x128x128xf32>
    %45 = vector.shape_cast %44 : vector<1x128x128xf32> to vector<128x128xf32>
    %cst_43 = arith.constant dense<0.000000e+00> : vector<24x128xf32>
    %46 = tpu.matmul %43, %45, %cst_43 {dimension_numbers = #tpu.dot_dimension_numbers<[1], [0], [0], [1], [0, 0, 1, 1], [], []>} : vector<24x128xf32>, vector<128x128xf32>, vector<24x128xf32> -> vector<24x128xf32>
    %47 = arith.addf %42, %46 : vector<24x128xf32>
    %48 = vector.shape_cast %47 : vector<24x128xf32> to vector<1x24x128xf32>
    %49 = vector.extract_strided_slice %48 {offsets = [0, 0, 0], sizes = [1, 16, 128], strides = [1, 1, 1]} : vector<1x24x128xf32> to vector<1x16x128xf32>
    %c0_44 = arith.constant 0 : index
    %c0_45 = arith.constant 0 : index
    %50 = vector.load %arg5[%c0_44, %c0_45] : memref<1x128xf32, #tpu.memory_space<vmem>>, vector<1x128xf32>
    %51 = vector.shape_cast %50 : vector<1x128xf32> to vector<1x1x128xf32>
    %52 = vector.broadcast %51 : vector<1x1x128xf32> to vector<1x16x128xf32>
    %53 = arith.addf %49, %52 : vector<1x16x128xf32>
    %cst_46 = arith.constant 5.000000e-01 : f32
    %54 = vector.broadcast %cst_46 : f32 to vector<1x16x128xf32>
    %55 = arith.mulf %54, %53 : vector<1x16x128xf32>
    %56 = arith.addf %3, %55 : vector<1x16x128xf32>
    %c0_47 = arith.constant 0 : index
    %c0_48 = arith.constant 0 : index
    %c0_49 = arith.constant 0 : index
    %57 = vector.load %arg6[%c0_47, %c0_48, %c0_49] : memref<1x16x128xf32, #tpu.memory_space<vmem>>, vector<1x16x128xf32>
    tpu.vector_store %arg6[%c0_47, %c0_48, %c0_49], %56 {strides = array<i32>} : memref<1x16x128xf32, #tpu.memory_space<vmem>>, vector<1x16x128xf32>,
    return
  }
  func.func @transform_0(%arg0: i32) -> (i32, i32, i32) {
    %c0_i32 = arith.constant 0 : i32
    %c0_i32_0 = arith.constant 0 : i32
    %c0_i32_1 = arith.constant 0 : i32
    return %arg0, %c0_i32, %c0_i32_0 : i32, i32, i32
  }
  func.func @transform_1(%arg0: i32) -> (i32, i32, i32) {
    %c0_i32 = arith.constant 0 : i32
    %c0_i32_0 = arith.constant 0 : i32
    %c0_i32_1 = arith.constant 0 : i32
    %c0_i32_2 = arith.constant 0 : i32
    return %c0_i32, %c0_i32_0, %c0_i32_1 : i32, i32, i32
  }
  func.func @transform_2(%arg0: i32) -> (i32, i32) {
    %c0_i32 = arith.constant 0 : i32
    %c0_i32_0 = arith.constant 0 : i32
    %c0_i32_1 = arith.constant 0 : i32
    return %c0_i32, %c0_i32_0 : i32, i32
  }
  func.func @transform_3(%arg0: i32) -> (i32, i32, i32) {
    %c0_i32 = arith.constant 0 : i32
    %c0_i32_0 = arith.constant 0 : i32
    %c0_i32_1 = arith.constant 0 : i32
    %c0_i32_2 = arith.constant 0 : i32
    return %c0_i32, %c0_i32_0, %c0_i32_1 : i32, i32, i32
  }
  func.func @transform_4(%arg0: i32) -> (i32, i32) {
    %c0_i32 = arith.constant 0 : i32
    %c0_i32_0 = arith.constant 0 : i32
    %c0_i32_1 = arith.constant 0 : i32
    return %c0_i32, %c0_i32_0 : i32, i32
  }
  func.func @transform_5(%arg0: i32) -> (i32, i32, i32) {
    %c0_i32 = arith.constant 0 : i32
    %c0_i32_0 = arith.constant 0 : i32
    %c0_i32_1 = arith.constant 0 : i32
    return %arg0, %c0_i32, %c0_i32_0 : i32, i32, i32
  }
}

</mosaic_0001>

<bundles_post_ra>
// kernel: tpu_custom_call.1
= control target key start
LH: loop header
LB: loop body
LE: loop exit
PB: predicated region body
PF: predicated region fallthrough
CT: control target
= control target key end

     0   :  { %10 = vsyncpa [#allocation4], 0  ;;  %s1404_s0 = inlined_call_operand.hbm [shape: f32[1,16,128], index: 0, kind: input, shape index: {}]   ;;  %s1405_s1 = inlined_call_operand.hbm [shape: f32[3,128,128], index: 1, kind: input, shape index: {}]   ;;  %s1406_s2 = inlined_call_operand.vmem [shape: f32[1,128], index: 2, kind: input, shape index: {}]   ;;  %s1407_s3 = inlined_call_operand.hbm [shape: f32[3,128,128], index: 3, kind: input, shape index: {}]   ;;  %s1408_s4 = inlined_call_operand.vmem [shape: f32[1,128], index: 4, kind: input, shape index: {}]   ;;  %s1409_s5 = inlined_call_operand.hbm [shape: f32[1,16,128], index: 5, kind: output, shape index: {}]  }
   0x1   :  { %11 = vsyncpa [#allocation7], 0 }
   0x2   :  { %12 = vsyncpa [#allocation5], 0  ;;  %s1169_s18 = smov [#allocation6]   ;;  %s1170_s20 = smov [#allocation3]  }
   0x3   :  { %s30_s19 = sshll.u32 %s1169_s18, 4  ;;  %s18_s21 = sshll.u32 %s1170_s20, 4  ;;  %s31_s19 = int_to_ptr.vmem [resolvable:$true] %s30_s19  ;;  %s19_s21 = int_to_ptr.vmem [resolvable:$true] %s18_s21 }
   0x4   :  { %s1091_s22 = scalar_lea.vmem %s31_s19, 6144  ;;  %p1096_p1 = scmp.lt.s32.totalorder %s31_s19, %s31_s19 }
   0x5   :  { %p1092_p0 = scmp.ne.s32.totalorder %s31_s19, %s1091_s22  ;;  %p1097_p2 = scmp.lt.s32.totalorder %s1091_s22, %s1091_s22 }
   0x7   :  { %p1098_p3 = por %p1097_p2, %p1096_p1 }
   0x9   :  { %p1099_p4 = pnand %p1098_p3, %p1092_p0 }
   0xb   :  { %1102 = shalt.err (!%p1099_p4)
}
   0xc   :  { %s1171_s23 = smov 128   ;;  %s1172_s24 = smov 8  }
   0xd   :  { %36 = dma.hbm_to_vmem [thread:$0]  %s1405_s1, 6144, %s31_s19, [#allocation7], %s1171_s23, %s1171_s23, %s1172_s24  }
   0xe   :  { %s1111_s27 = scalar_lea.vmem %s19_s21, 256  ;;  %p1116_p6 = scmp.lt.s32.totalorder %s19_s21, %s19_s21 }
   0xf   :  { %p1112_p5 = scmp.ne.s32.totalorder %s19_s21, %s1111_s27  ;;  %p1117_p7 = scmp.lt.s32.totalorder %s1111_s27, %s1111_s27 }
  0x11   :  { %p1118_p8 = por %p1117_p7, %p1116_p6 }
  0x13   :  { %p1119_p9 = pnand %p1118_p8, %p1112_p5 }
  0x15   :  { %1122 = shalt.err (!%p1119_p9)
}
  0x16   :  { %24 = dma.hbm_to_vmem [thread:$0]  %s1404_s0, 256, %s19_s21, [#allocation4], %s1171_s23, %s1171_s23, %s1172_s24  }
  0x17   :  { %s1173_s30 = smov [#allocation8]  }
  0x18   :  { %s44_s6 = sshll.u32 %s1173_s30, 4  ;;  %s45_s6 = int_to_ptr.vmem [resolvable:$true] %s44_s6 }
  0x19   :  { %s1131_s7 = scalar_lea.vmem %s45_s6, 6144  ;;  %p1136_p11 = scmp.lt.s32.totalorder %s45_s6, %s45_s6 }
  0x1a   :  { %p1132_p10 = scmp.ne.s32.totalorder %s45_s6, %s1131_s7  ;;  %p1137_p12 = scmp.lt.s32.totalorder %s1131_s7, %s1131_s7 }
  0x1c   :  { %p1138_p13 = por %p1137_p12, %p1136_p11 }
  0x1e   :  { %p1139_p0 = pnand %p1138_p13, %p1132_p10 }
  0x20   :  { %1142 = shalt.err (!%p1139_p0)
}
  0x21   :  { %50 = dma.hbm_to_vmem [thread:$0]  %s1407_s3, 6144, %s45_s6, [#allocation7], %s1171_s23, %s1171_s23, %s1172_s24  }
  0x22   :  { %1163 = dma.done.wait [#allocation4], 256  }
  0x23   :  { %1164 = vsyncadd [#allocation4], 4294967040 }
  0x24   :  { %1165 = dma.done.wait [#allocation7], 12288  }
  0x25   :  { %1166 = vsyncadd [#allocation7], 4294955008  ;;  %v1174_v0 = vmov 0.0   ;;  %vm1175_vm0 = vmmov 0   ;;  %v108_v1 = vld [vmem:[#allocation6 + $0xf8] sm:$0xff]  ;;  %v107_v3 = vld [vmem:[#allocation6 + $0xf0] sm:$0xff] }
  0x26   :  { %829 = vmatprep.subr.mxu0 %v1174_v0  ;;  %62 = vst [vmem:[#allocation2] sm:$0xff] %v1174_v0  ;;  %69 = vst [vmem:[#allocation2 + $0x18] sm:$0xff] %v1174_v0  ;;  %870 = vmatprep.subr.mxu1 %v1174_v0  ;;  %v88_v2 = vld [vmem:[#allocation6 + $0x78] sm:$0xff]  ;;  %v87_v4 = vld [vmem:[#allocation6 + $0x70] sm:$0xff]  ;;  %s1176_s10 = smov [#allocation9]  }
  0x27   :  { %861 = vmatprep.mubr.msk.f32.mxu0 %vm1175_vm0, %v1174_v0  ;;  %902 = vmatprep.mubr.msk.f32.mxu1 %vm1175_vm0, %v1174_v0  ;;  %v106_v5 = vld [vmem:[#allocation6 + $0xe8] sm:$0xff]  ;;  %v105_v7 = vld [vmem:[#allocation6 + $0xe0] sm:$0xff]  ;;  %v104_v9 = vld [vmem:[#allocation6 + $0xd8] sm:$0xff]  ;;  %s700_s11 = sshll.u32 %s1176_s10, 4  ;;  %s701_s11 = int_to_ptr.vmem [resolvable:$true] %s700_s11 }
  0x28   :  { %830 = vmatpush3.msra.mxu0 %v108_v1  ;;  %871 = vmatpush3.msra.mxu1 %v88_v2  ;;  %v86_v6 = vld [vmem:[#allocation6 + $0x68] sm:$0xff]  ;;  %v85_v8 = vld [vmem:[#allocation6 + $0x60] sm:$0xff]  ;;  %v84_v10 = vld [vmem:[#allocation6 + $0x58] sm:$0xff]  ;;  %p1148_p2 = scmp.lt.s32.totalorder %s701_s11, %s701_s11 }
  0x29   :  { %831 = vmatprep.subr.mxu0 %v1174_v0  ;;  %872 = vmatprep.subr.mxu1 %v1174_v0  ;;  %v103_v11 = vld [vmem:[#allocation6 + $0xd0] sm:$0xff]  ;;  %v102_v13 = vld [vmem:[#allocation6 + $0xc8] sm:$0xff]  ;;  %v101_v17 = vld [vmem:[#allocation6 + $0xc0] sm:$0xff] }
  0x2a   :  { %832 = vmatpush3.msra.mxu0 %v107_v3  ;;  %873 = vmatpush3.msra.mxu1 %v87_v4  ;;  %v83_v12 = vld [vmem:[#allocation6 + $0x50] sm:$0xff]  ;;  %v82_v14 = vld [vmem:[#allocation6 + $0x48] sm:$0xff]  ;;  %v81_v18 = vld [vmem:[#allocation6 + $0x40] sm:$0xff] }
  0x2b   :  { %833 = vmatprep.subr.mxu0 %v1174_v0  ;;  %874 = vmatprep.subr.mxu1 %v1174_v0  ;;  %v1243_v15 = vld [vmem:[#allocation3] sm:$0xff]  ;;  %v100_v19 = vld [vmem:[#allocation6 + $0xb8] sm:$0xff]  ;;  %v98_v25 = vld [vmem:[#allocation6 + $0xa8] sm:$0xff] }
  0x2c   :  { %834 = vmatpush3.msra.mxu0 %v106_v5  ;;  %875 = vmatpush3.msra.mxu1 %v86_v6  ;;  %v65_v16 = vmax.f32 %v1243_v15, 0.0  ;;  %v80_v20 = vld [vmem:[#allocation6 + $0x38] sm:$0xff]  ;;  %v99_v23 = vld [vmem:[#allocation6 + $0xb0] sm:$0xff]  ;;  %v78_v26 = vld [vmem:[#allocation6 + $0x28] sm:$0xff] }
  0x2d   :  { %835 = vmatprep.subr.mxu0 %v1174_v0  ;;  %876 = vmatprep.subr.mxu1 %v1174_v0  ;;  %v1252_v21 = vld [vmem:[#allocation3 + $0x8] sm:$0xff]  ;;  %v79_v24 = vld [vmem:[#allocation6 + $0x30] sm:$0xff]  ;;  %v97_v27 = vld [vmem:[#allocation6 + $0xa0] sm:$0xff] }
  0x2e   :  { %836 = vmatpush3.msra.mxu0 %v105_v7  ;;  %877 = vmatpush3.msra.mxu1 %v85_v8  ;;  %67 = vst [vmem:[#allocation2 + $0x8] sm:$0xff] %v65_v16  ;;  %v66_v22 = vmax.f32 %v1252_v21, 0.0  ;;  %v77_v28 = vld [vmem:[#allocation6 + $0x20] sm:$0xff]  ;;  %v96_v29 = vld [vmem:[#allocation6 + $0x98] sm:$0xff]  ;;  %v95_v31 = vld [vmem:[#allocation6 + $0x90] sm:$0xff] }
  0x2f   :  { %837 = vmatprep.subr.mxu0 %v1174_v0  ;;  %878 = vmatprep.subr.mxu1 %v1174_v0  ;;  %v76_v30 = vld [vmem:[#allocation6 + $0x18] sm:$0xff]  ;;  %v75_v32 = vld [vmem:[#allocation6 + $0x10] sm:$0xff]  ;;  %v94_v33 = vld [vmem:[#allocation6 + $0x88] sm:$0xff] }
  0x30   :  { %838 = vmatpush3.msra.mxu0 %v104_v9  ;;  %879 = vmatpush3.msra.mxu1 %v84_v10  ;;  %68 = vst [vmem:[#allocation2 + $0x10] sm:$0xff] %v66_v22  ;;  %v74_v34 = vld [vmem:[#allocation6 + $0x8] sm:$0xff]  ;;  %v93_v35 = vld [vmem:[#allocation6 + $0x80] sm:$0xff]  ;;  %v286_v39 = vld [vmem:[#allocation6 + $0x178] sm:$0xff] }
  0x31   :  { %839 = vmatprep.subr.mxu0 %v1174_v0  ;;  %880 = vmatprep.subr.mxu1 %v1174_v0  ;;  %v73_v36 = vld [vmem:[#allocation6] sm:$0xff]  ;;  %v285_v40 = vld [vmem:[#allocation6 + $0x170] sm:$0xff]  ;;  %v284_v42 = vld [vmem:[#allocation6 + $0x168] sm:$0xff] }
  0x32   :  { %840 = vmatpush3.msra.mxu0 %v103_v11  ;;  %881 = vmatpush3.msra.mxu1 %v83_v12  ;;  %v283_v44 = vld [vmem:[#allocation6 + $0x160] sm:$0xff]  ;;  %v282_v46 = vld [vmem:[#allocation6 + $0x158] sm:$0xff]  ;;  %v281_v47 = vld [vmem:[#allocation6 + $0x150] sm:$0xff] }
  0x33   :  { %841 = vmatprep.subr.mxu0 %v1174_v0  ;;  %882 = vmatprep.subr.mxu1 %v1174_v0  ;;  %v280_v48 = vld [vmem:[#allocation6 + $0x148] sm:$0xff]  ;;  %v279_v49 = vld [vmem:[#allocation6 + $0x140] sm:$0xff]  ;;  %v278_v50 = vld [vmem:[#allocation6 + $0x138] sm:$0xff] }
  0x34   :  { %842 = vmatpush3.msra.mxu0 %v102_v13  ;;  %883 = vmatpush3.msra.mxu1 %v82_v14  ;;  %v277_v51 = vld [vmem:[#allocation6 + $0x130] sm:$0xff]  ;;  %v276_v52 = vld [vmem:[#allocation6 + $0x128] sm:$0xff]  ;;  %v275_v53 = vld [vmem:[#allocation6 + $0x120] sm:$0xff] }
  0x35   :  { %843 = vmatprep.subr.mxu0 %v1174_v0  ;;  %884 = vmatprep.subr.mxu1 %v1174_v0  ;;  %v89_v37 = vld [vmem:[#allocation2 + $0x7] sm:$0xff]  ;;  %v272_v56 = vld [vmem:[#allocation6 + $0x108] sm:$0xff]  ;;  %v271_v57 = vld [vmem:[#allocation6 + $0x100] sm:$0xff] }
  0x36   :  { %844 = vmatpush3.msra.mxu0 %v101_v17  ;;  %885 = vmatpush3.msra.mxu1 %v81_v18  ;;  %v70_v38 = vld [vmem:[#allocation2 + $0x6] sm:$0xff]  ;;  %v418_v62 = vld [vmem:[#allocation8 + $0xe8] sm:$0xff]  ;;  %v417_v1 = vld [vmem:[#allocation8 + $0xe0] sm:$0xff] }
  0x37   :  { %845 = vmatprep.subr.mxu0 %v1174_v0  ;;  %886 = vmatprep.subr.mxu1 %v1174_v0  ;;  %v90_v41 = vld [vmem:[#allocation2 + $0xf] sm:$0xff]  ;;  %v91_v45 = vld [vmem:[#allocation2 + $0x17] sm:$0xff]  ;;  %v273_v55 = vld [vmem:[#allocation6 + $0x110] sm:$0xff] }
  0x38   :  { %846 = vmatpush3.msra.mxu0 %v100_v19  ;;  %887 = vmatpush3.msra.mxu1 %v80_v20  ;;  %v71_v43 = vld [vmem:[#allocation2 + $0xe] sm:$0xff]  ;;  %v419_v60 = vld [vmem:[#allocation8 + $0xf0] sm:$0xff]  ;;  %v398_v63 = vld [vmem:[#allocation8 + $0x68] sm:$0xff] }
  0x39   :  { %847 = vmatprep.subr.mxu0 %v1174_v0  ;;  %888 = vmatprep.subr.mxu1 %v1174_v0  ;;  %v274_v54 = vld [vmem:[#allocation6 + $0x118] sm:$0xff]  ;;  %v399_v61 = vld [vmem:[#allocation8 + $0x70] sm:$0xff]  ;;  %v397_v2 = vld [vmem:[#allocation8 + $0x60] sm:$0xff] }
  0x3a   :  { %848 = vmatpush3.msra.mxu0 %v99_v23  ;;  %889 = vmatpush3.msra.mxu1 %v79_v24  ;;  %v420_v58 = vld [vmem:[#allocation8 + $0xf8] sm:$0xff]  ;;  %v415_v5 = vld [vmem:[#allocation8 + $0xd0] sm:$0xff]  ;;  %v414_v7 = vld [vmem:[#allocation8 + $0xc8] sm:$0xff] }
  0x3b   :  { %849 = vmatprep.subr.mxu0 %v1174_v0  ;;  %890 = vmatprep.subr.mxu1 %v1174_v0  ;;  %v400_v59 = vld [vmem:[#allocation8 + $0x78] sm:$0xff]  ;;  %v395_v6 = vld [vmem:[#allocation8 + $0x50] sm:$0xff]  ;;  %v394_v8 = vld [vmem:[#allocation8 + $0x48] sm:$0xff] }
  0x3c   :  { %850 = vmatpush3.msra.mxu0 %v98_v25  ;;  %891 = vmatpush3.msra.mxu1 %v78_v26  ;;  %v416_v3 = vld [vmem:[#allocation8 + $0xd8] sm:$0xff]  ;;  %v413_v9 = vld [vmem:[#allocation8 + $0xc0] sm:$0xff]  ;;  %v411_v13 = vld [vmem:[#allocation8 + $0xb0] sm:$0xff] }
  0x3d   :  { %851 = vmatprep.subr.mxu0 %v1174_v0  ;;  %892 = vmatprep.subr.mxu1 %v1174_v0  ;;  %v396_v4 = vld [vmem:[#allocation8 + $0x58] sm:$0xff]  ;;  %v393_v10 = vld [vmem:[#allocation8 + $0x40] sm:$0xff]  ;;  %v391_v14 = vld [vmem:[#allocation8 + $0x30] sm:$0xff] }
  0x3e   :  { %852 = vmatpush3.msra.mxu0 %v97_v27  ;;  %893 = vmatpush3.msra.mxu1 %v77_v28  ;;  %v412_v11 = vld [vmem:[#allocation8 + $0xb8] sm:$0xff]  ;;  %v390_v17 = vld [vmem:[#allocation8 + $0x28] sm:$0xff]  ;;  %v409_v18 = vld [vmem:[#allocation8 + $0xa0] sm:$0xff] }
  0x3f   :  { %853 = vmatprep.subr.mxu0 %v1174_v0  ;;  %894 = vmatprep.subr.mxu1 %v1174_v0  ;;  %v392_v12 = vld [vmem:[#allocation8 + $0x38] sm:$0xff]  ;;  %v389_v19 = vld [vmem:[#allocation8 + $0x20] sm:$0xff]  ;;  %v407_v24 = vld [vmem:[#allocation8 + $0x90] sm:$0xff] }
  0x40   :  { %854 = vmatpush3.msra.mxu0 %v96_v29  ;;  %895 = vmatpush3.msra.mxu1 %v76_v30  ;;  %v408_v20 = vld [vmem:[#allocation8 + $0x98] sm:$0xff]  ;;  %v72_v23 = vld [vmem:[#allocation2 + $0x16] sm:$0xff]  ;;  %v387_v25 = vld [vmem:[#allocation8 + $0x10] sm:$0xff] }
  0x41   :  { %855 = vmatprep.subr.mxu0 %v1174_v0  ;;  %896 = vmatprep.subr.mxu1 %v1174_v0  ;;  %381 = vst [vmem:[#allocation2 + $0x18] sm:$0xff] %v1174_v0  ;;  %v406_v26 = vld [vmem:[#allocation8 + $0x88] sm:$0xff]  ;;  %v405_v28 = vld [vmem:[#allocation8 + $0x80] sm:$0xff] }
  0x42   :  { %856 = vmatpush3.msra.mxu0 %v95_v31  ;;  %897 = vmatpush3.msra.mxu1 %v75_v32  ;;  %v386_v27 = vld [vmem:[#allocation8 + $0x8] sm:$0xff]  ;;  %v385_v29 = vld [vmem:[#allocation8] sm:$0xff] }
  0x43   :  { %857 = vmatprep.subr.mxu0 %v1174_v0  ;;  %898 = vmatprep.subr.mxu1 %v1174_v0 }
  0x44   :  { %858 = vmatpush3.msra.mxu0 %v94_v33  ;;  %899 = vmatpush3.msra.mxu1 %v74_v34 }
  0x45   :  { %859 = vmatprep.subr.mxu0 %v1174_v0  ;;  %900 = vmatprep.subr.mxu1 %v1174_v0 }
  0x46   :  { %860 = vmatpush3.msra.mxu0 %v93_v35  ;;  %901 = vmatpush3.msra.mxu1 %v73_v36 }
  0x47   :  { %862 = vmatmul.mubr.f32.vlgmr.msra.gmra.mxu0 %v89_v37  ;;  %911 = vmatprep.subr.mxu0 %v1174_v0 }
  0x48   :  { %903 = vmatmul.mubr.f32.vlgmr.msra.gmra.mxu1 %v70_v38  ;;  %912 = vmatpush3.msra.mxu0 %v286_v39 }
  0x49   :  { %913 = vmatprep.subr.mxu0 %v1174_v0  ;;  %864 = vmatprep.mubr.msk.f32.mxu0 %vm1175_vm0, %v1174_v0 }
  0x4a   :  { %914 = vmatpush3.msra.mxu0 %v285_v40  ;;  %905 = vmatprep.mubr.msk.f32.mxu1 %vm1175_vm0, %v1174_v0 }
  0x4b   :  { %915 = vmatprep.subr.mxu0 %v1174_v0  ;;  %865 = vmatmul.mubr.f32.gmra.mxu0 %v90_v41 }
  0x4c   :  { %916 = vmatpush3.msra.mxu0 %v284_v42  ;;  %906 = vmatmul.mubr.f32.gmra.mxu1 %v71_v43  ;;  %v713_v42 = vld [vmem:[%s1406_s2] ss:$0 sm:$0xff] }
  0x4d   :  { %917 = vmatprep.subr.mxu0 %v1174_v0  ;;  %867 = vmatprep.mubr.msk.f32.mxu0 %vm1175_vm0, %v1174_v0 }
  0x4e   :  { %918 = vmatpush3.msra.mxu0 %v283_v44  ;;  %952 = vmatprep.subr.mxu1 %v1174_v0 }
  0x4f   :  { %919 = vmatprep.subr.mxu0 %v1174_v0  ;;  %868 = vmatmul.mubr.f32.gmra.mxu0 %v91_v45 }
  0x50   :  { %920 = vmatpush3.msra.mxu0 %v282_v46  ;;  %943 = vmatprep.mubr.msk.f32.mxu0 %vm1175_vm0, %v1174_v0 }
  0x51   :  { %921 = vmatprep.subr.mxu0 %v1174_v0  ;;  %908 = vmatprep.mubr.msk.f32.mxu1 %vm1175_vm0, %v1174_v0 }
  0x52   :  { %922 = vmatpush3.msra.mxu0 %v281_v47  ;;  %953 = vmatpush3.msra.mxu1 %v420_v58  ;;  %v597_v58 = vld [vmem:[#allocation8 + $0x170] sm:$0xff] }
  0x53   :  { %923 = vmatprep.subr.mxu0 %v1174_v0  ;;  %954 = vmatprep.subr.mxu1 %v1174_v0 }
  0x54   :  { %924 = vmatpush3.msra.mxu0 %v280_v48  ;;  %955 = vmatpush3.msra.mxu1 %v419_v60 }
  0x55   :  { %925 = vmatprep.subr.mxu0 %v1174_v0  ;;  %956 = vmatprep.subr.mxu1 %v1174_v0 }
  0x56   :  { %926 = vmatpush3.msra.mxu0 %v279_v49  ;;  %957 = vmatpush3.msra.mxu1 %v418_v62  ;;  %v595_v62 = vld [vmem:[#allocation8 + $0x160] sm:$0xff] }
  0x57   :  { %927 = vmatprep.subr.mxu0 %v1174_v0  ;;  %958 = vmatprep.subr.mxu1 %v1174_v0 }
  0x58   :  { %928 = vmatpush3.msra.mxu0 %v278_v50  ;;  %959 = vmatpush3.msra.mxu1 %v417_v1 }
  0x59   :  { %929 = vmatprep.subr.mxu0 %v1174_v0  ;;  %960 = vmatprep.subr.mxu1 %v1174_v0 }
  0x5a   :  { %930 = vmatpush3.msra.mxu0 %v277_v51  ;;  %961 = vmatpush3.msra.mxu1 %v416_v3  ;;  %v593_v3 = vld [vmem:[#allocation8 + $0x150] sm:$0xff] }
  0x5b   :  { %931 = vmatprep.subr.mxu0 %v1174_v0  ;;  %962 = vmatprep.subr.mxu1 %v1174_v0 }
  0x5c   :  { %932 = vmatpush3.msra.mxu0 %v276_v52  ;;  %963 = vmatpush3.msra.mxu1 %v415_v5  ;;  %v591_v5 = vld [vmem:[#allocation8 + $0x140] sm:$0xff] }
  0x5d   :  { %933 = vmatprep.subr.mxu0 %v1174_v0  ;;  %964 = vmatprep.subr.mxu1 %v1174_v0 }
  0x5e   :  { %934 = vmatpush3.msra.mxu0 %v275_v53  ;;  %965 = vmatpush3.msra.mxu1 %v414_v7  ;;  %v589_v7 = vld [vmem:[#allocation8 + $0x130] sm:$0xff] }
  0x5f   :  { %935 = vmatprep.subr.mxu0 %v1174_v0  ;;  %966 = vmatprep.subr.mxu1 %v1174_v0 }
  0x60   :  { %936 = vmatpush3.msra.mxu0 %v274_v54  ;;  %967 = vmatpush3.msra.mxu1 %v413_v9  ;;  %v587_v9 = vld [vmem:[#allocation8 + $0x120] sm:$0xff] }
  0x61   :  { %937 = vmatprep.subr.mxu0 %v1174_v0  ;;  %968 = vmatprep.subr.mxu1 %v1174_v0 }
  0x62   :  { %938 = vmatpush3.msra.mxu0 %v273_v55  ;;  %969 = vmatpush3.msra.mxu1 %v412_v11  ;;  %v598_v55 = vld [vmem:[#allocation8 + $0x178] sm:$0xff]  ;;  %v585_v11 = vld [vmem:[#allocation8 + $0x110] sm:$0xff] }
  0x63   :  { %939 = vmatprep.subr.mxu0 %v1174_v0  ;;  %970 = vmatprep.subr.mxu1 %v1174_v0 }
  0x64   :  { %940 = vmatpush3.msra.mxu0 %v272_v56  ;;  %971 = vmatpush3.msra.mxu1 %v411_v13  ;;  %v583_v13 = vld [vmem:[#allocation8 + $0x100] sm:$0xff] }
  0x65   :  { %941 = vmatprep.subr.mxu0 %v1174_v0  ;;  %972 = vmatprep.subr.mxu1 %v1174_v0 }
  0x66   :  { %942 = vmatpush3.msra.mxu0 %v271_v57  ;;  %909 = vmatmul.mubr.f32.gmra.mxu1 %v72_v23 }
  0x67   :  { %944 = vmatmul.mubr.f32.vlgmr.msra.gmra.mxu0 %v65_v16  ;;  %993 = vmatprep.subr.mxu0 %v1174_v0  ;;  %v410_v16 = vld [vmem:[#allocation8 + $0xa8] sm:$0xff] }
  0x68   :  { %946 = vmatprep.mubr.msk.f32.mxu0 %vm1175_vm0, %v1174_v0  ;;  %994 = vmatpush3.msra.mxu0 %v400_v59  ;;  %v596_v59 = vld [vmem:[#allocation8 + $0x168] sm:$0xff] }
  0x69   :  { %995 = vmatprep.subr.mxu0 %v1174_v0  ;;  %973 = vmatpush3.msra.mxu1 %v410_v16 }
  0x6a   :  { %996 = vmatpush3.msra.mxu0 %v399_v61  ;;  %974 = vmatprep.subr.mxu1 %v1174_v0 }
  0x6b   :  { %947 = vmatmul.mubr.f32.gmra.mxu0 %v66_v22  ;;  %997 = vmatprep.subr.mxu0 %v1174_v0  ;;  %v388_v22 = vld [vmem:[#allocation8 + $0x18] sm:$0xff] }
  0x6c   :  { %949 = vmatprep.mubr.msk.f32.mxu0 %vm1175_vm0, %v1174_v0  ;;  %998 = vmatpush3.msra.mxu0 %v398_v63  ;;  %v594_v63 = vld [vmem:[#allocation8 + $0x158] sm:$0xff] }
  0x6d   :  { %999 = vmatprep.subr.mxu0 %v1174_v0  ;;  %975 = vmatpush3.msra.mxu1 %v409_v18 }
  0x6e   :  { %1000 = vmatpush3.msra.mxu0 %v397_v2  ;;  %976 = vmatprep.subr.mxu1 %v1174_v0 }
  0x6f   :  { %950 = vmatmul.mubr.f32.gmra.mxu0 %v1174_v0  ;;  %1001 = vmatprep.subr.mxu0 %v1174_v0 }
  0x70   :  { %1025 = vmatprep.mubr.msk.f32.mxu0 %vm1175_vm0, %v1174_v0  ;;  %1002 = vmatpush3.msra.mxu0 %v396_v4  ;;  %v592_v4 = vld [vmem:[#allocation8 + $0x148] sm:$0xff] }
  0x71   :  { %1003 = vmatprep.subr.mxu0 %v1174_v0  ;;  %977 = vmatpush3.msra.mxu1 %v408_v20 }
  0x72   :  { %1004 = vmatpush3.msra.mxu0 %v395_v6  ;;  %978 = vmatprep.subr.mxu1 %v1174_v0  ;;  %v590_v6 = vld [vmem:[#allocation8 + $0x138] sm:$0xff] }
  0x73   :  { %1005 = vmatprep.subr.mxu0 %v1174_v0  ;;  %979 = vmatpush3.msra.mxu1 %v407_v24 }
  0x74   :  { %1006 = vmatpush3.msra.mxu0 %v394_v8  ;;  %980 = vmatprep.subr.mxu1 %v1174_v0  ;;  %v588_v8 = vld [vmem:[#allocation8 + $0x128] sm:$0xff] }
  0x75   :  { %1007 = vmatprep.subr.mxu0 %v1174_v0  ;;  %981 = vmatpush3.msra.mxu1 %v406_v26 }
  0x76   :  { %1008 = vmatpush3.msra.mxu0 %v393_v10  ;;  %982 = vmatprep.subr.mxu1 %v1174_v0  ;;  %v586_v10 = vld [vmem:[#allocation8 + $0x118] sm:$0xff] }
  0x77   :  { %1009 = vmatprep.subr.mxu0 %v1174_v0  ;;  %983 = vmatpush3.msra.mxu1 %v405_v28 }
  0x78   :  { %1010 = vmatpush3.msra.mxu0 %v392_v12  ;;  %984 = vmatprep.mubr.msk.f32.mxu1 %vm1175_vm0, %v1174_v0  ;;  %v584_v12 = vld [vmem:[#allocation8 + $0x108] sm:$0xff] }
  0x79   :  { %1011 = vmatprep.subr.mxu0 %v1174_v0  ;;  %1034 = vmatprep.subr.mxu1 %v1174_v0 }
  0x7a   :  { %1012 = vmatpush3.msra.mxu0 %v391_v14 }
  0x7b   :  { %1013 = vmatprep.subr.mxu0 %v1174_v0 }
  0x7c   :  { %1014 = vmatpush3.msra.mxu0 %v390_v17 }
  0x7d   :  { %1015 = vmatprep.subr.mxu0 %v1174_v0 }
  0x7e   :  { %1016 = vmatpush3.msra.mxu0 %v389_v19 }
  0x7f   :  { %1017 = vmatprep.subr.mxu0 %v1174_v0 }
  0x80   :  { %1018 = vmatpush3.msra.mxu0 %v388_v22 }
  0x81   :  { %1019 = vmatprep.subr.mxu0 %v1174_v0 }
  0x82   :  { %1020 = vmatpush3.msra.mxu0 %v387_v25 }
  0x83   :  { %1021 = vmatprep.subr.mxu0 %v1174_v0 }
  0x84   :  { %1022 = vmatpush3.msra.mxu0 %v386_v27 }
  0x85   :  { %1023 = vmatprep.subr.mxu0 %v1174_v0 }
  0x86   :  { %1024 = vmatpush3.msra.mxu0 %v385_v29 }
 0x107   :  { %v175_v30 = vpop.f32.mrf.mxu0 }
 0x108   :  { %v254_v31 = vpop.f32.mrf.mxu1 }
 0x109   :  { %v863_v32 = vpop.f32.mrf.mxu0  ;;  %v255_v40 = vadd.f32 %v254_v31, %v175_v30 }
 0x10a   :  { %v904_v33 = vpop.f32.mrf.mxu1 }
 0x10b   :  { %v180_v34 = vpop.f32.mrf.mxu0 }
 0x10c   :  { %v259_v35 = vpop.f32.mrf.mxu1 }
 0x10d   :  { %v866_v36 = vpop.f32.mrf.mxu0  ;;  %v260_v45 = vadd.f32 %v259_v35, %v180_v34 }
 0x10e   :  { %v907_v37 = vpop.f32.mrf.mxu1 }
 0x10f   :  { %v185_v38 = vpop.f32.mrf.mxu0 }
 0x111   :  { %v869_v39 = vpop.f32.mrf.mxu0 }
 0x126   :  { %v264_v14 = vpop.f32.mrf.mxu1 }
 0x127   :  { %v353_v41 = vpop.f32.mrf.mxu0 }
 0x128   :  { %v366_v43 = vadd.f32 %v353_v41, %v255_v40  ;;  %v910_v16 = vpop.f32.mrf.mxu1 }
 0x129   :  { %v945_v44 = vpop.f32.mrf.mxu0 }
 0x12a   :  { %v1349_v46 = vadd.f32 %v713_v42, %v366_v43 }
 0x12b   :  { %v358_v47 = vpop.f32.mrf.mxu0 }
 0x12c   :  { %v377_v48 = vmax.f32 %v1349_v46, 0.0  ;;  %v367_v49 = vadd.f32 %v358_v47, %v260_v45 }
 0x12d   :  { %v948_v50 = vpop.f32.mrf.mxu0 }
 0x12e   :  { %379 = vst [vmem:[#allocation2 + $0x8] sm:$0xff] %v377_v48  ;;  %v1354_v51 = vadd.f32 %v713_v42, %v367_v49 }
 0x12f   :  { %v363_v52 = vpop.f32.mrf.mxu0 }
 0x130   :  { %v378_v53 = vmax.f32 %v1354_v51, 0.0 }
 0x131   :  { %v951_v54 = vpop.f32.mrf.mxu0 }
 0x132   :  { %380 = vst [vmem:[#allocation2 + $0x10] sm:$0xff] %v378_v53 }
 0x135   :  { %v401_v56 = vld [vmem:[#allocation2 + $0x7] sm:$0xff] }
 0x136   :  { %v382_v57 = vld [vmem:[#allocation2 + $0x6] sm:$0xff]  ;;  %985 = vmatmul.mubr.f32.vlgmr.msra.gmra.mxu1 %v401_v56 }
 0x137   :  { %1026 = vmatmul.mubr.f32.vlgmr.msra.gmra.mxu0 %v382_v57  ;;  %1035 = vmatpush3.msra.mxu1 %v598_v55 }
 0x138   :  { %987 = vmatprep.mubr.msk.f32.mxu1 %vm1175_vm0, %v1174_v0  ;;  %1036 = vmatprep.subr.mxu1 %v1174_v0 }
 0x139   :  { %1028 = vmatprep.mubr.msk.f32.mxu0 %vm1175_vm0, %v1174_v0  ;;  %1037 = vmatpush3.msra.mxu1 %v597_v58  ;;  %v402_v60 = vld [vmem:[#allocation2 + $0xf] sm:$0xff]  ;;  %v403_v1 = vld [vmem:[#allocation2 + $0x17] sm:$0xff] }
 0x13a   :  { %v383_v61 = vld [vmem:[#allocation2 + $0xe] sm:$0xff]  ;;  %1038 = vmatprep.subr.mxu1 %v1174_v0  ;;  %988 = vmatmul.mubr.f32.gmra.mxu1 %v402_v60  ;;  %v384_v2 = vld [vmem:[#allocation2 + $0x16] sm:$0xff] }
 0x13b   :  { %1029 = vmatmul.mubr.f32.gmra.mxu0 %v383_v61  ;;  %1039 = vmatpush3.msra.mxu1 %v596_v59 }
 0x13c   :  { %1040 = vmatprep.subr.mxu1 %v1174_v0  ;;  %990 = vmatprep.mubr.msk.f32.mxu1 %vm1175_vm0, %v1174_v0 }
 0x13d   :  { %1041 = vmatpush3.msra.mxu1 %v595_v62  ;;  %1031 = vmatprep.mubr.msk.f32.mxu0 %vm1175_vm0, %v1174_v0 }
 0x13e   :  { %1042 = vmatprep.subr.mxu1 %v1174_v0  ;;  %991 = vmatmul.mubr.f32.gmra.mxu1 %v403_v1 }
 0x13f   :  { %1032 = vmatmul.mubr.f32.gmra.mxu0 %v384_v2  ;;  %1043 = vmatpush3.msra.mxu1 %v594_v63 }
 0x140   :  { %1044 = vmatprep.subr.mxu1 %v1174_v0  ;;  %1066 = vmatprep.mubr.msk.f32.mxu1 %vm1175_vm0, %v1174_v0 }
 0x141   :  { %1045 = vmatpush3.msra.mxu1 %v593_v3 }
 0x142   :  { %1046 = vmatprep.subr.mxu1 %v1174_v0 }
 0x143   :  { %1047 = vmatpush3.msra.mxu1 %v592_v4 }
 0x144   :  { %1048 = vmatprep.subr.mxu1 %v1174_v0 }
 0x145   :  { %1049 = vmatpush3.msra.mxu1 %v591_v5 }
 0x146   :  { %1050 = vmatprep.subr.mxu1 %v1174_v0 }
 0x147   :  { %1051 = vmatpush3.msra.mxu1 %v590_v6 }
 0x148   :  { %1052 = vmatprep.subr.mxu1 %v1174_v0 }
 0x149   :  { %1053 = vmatpush3.msra.mxu1 %v589_v7 }
 0x14a   :  { %1054 = vmatprep.subr.mxu1 %v1174_v0 }
 0x14b   :  { %1055 = vmatpush3.msra.mxu1 %v588_v8 }
 0x14c   :  { %1056 = vmatprep.subr.mxu1 %v1174_v0 }
 0x14d   :  { %1057 = vmatpush3.msra.mxu1 %v587_v9 }
 0x14e   :  { %1058 = vmatprep.subr.mxu1 %v1174_v0 }
 0x14f   :  { %1059 = vmatpush3.msra.mxu1 %v586_v10 }
 0x150   :  { %1060 = vmatprep.subr.mxu1 %v1174_v0 }
 0x151   :  { %1061 = vmatpush3.msra.mxu1 %v585_v11 }
 0x152   :  { %1062 = vmatprep.subr.mxu1 %v1174_v0 }
 0x153   :  { %1063 = vmatpush3.msra.mxu1 %v584_v12 }
 0x154   :  { %1064 = vmatprep.subr.mxu1 %v1174_v0 }
 0x155   :  { %1065 = vmatpush3.msra.mxu1 %v583_v13 }
 0x156   :  { %1067 = vmatmul.mubr.f32.vlgmr.msra.gmra.mxu1 %v377_v48 }
 0x157   :  { %1069 = vmatprep.mubr.msk.f32.mxu1 %vm1175_vm0, %v1174_v0 }
 0x15a   :  { %1070 = vmatmul.mubr.f32.gmra.mxu1 %v378_v53 }
 0x15b   :  { %1072 = vmatprep.mubr.msk.f32.mxu1 %vm1175_vm0, %v1174_v0 }
 0x15e   :  { %1073 = vmatmul.mubr.f32.gmra.mxu1 %v1174_v0  ;;  %v714_v0 = vld [vmem:[%s1408_s4] ss:$0 sm:$0xff]  ;;  %s1143_s4 = scalar_lea.vmem %s701_s11, 256 }
 0x15f   :  { %p1144_p1 = scmp.ne.s32.totalorder %s701_s11, %s1143_s4  ;;  %p1149_p3 = scmp.lt.s32.totalorder %s1143_s4, %s1143_s4 }
 0x161   :  { %p1150_p4 = por %p1149_p3, %p1148_p2 }
 0x163   :  { %p1151_p5 = pnand %p1150_p4, %p1144_p1 }
 0x1f6   :  { %v487_v17 = vpop.f32.mrf.mxu1 }
 0x1f7   :  { %v566_v18 = vpop.f32.mrf.mxu0 }
 0x1f8   :  { %v986_v19 = vpop.f32.mrf.mxu1  ;;  %v567_v30 = vadd.f32 %v566_v18, %v487_v17 }
 0x1f9   :  { %v1027_v20 = vpop.f32.mrf.mxu0 }
 0x1fa   :  { %v492_v22 = vpop.f32.mrf.mxu1 }
 0x1fb   :  { %v571_v23 = vpop.f32.mrf.mxu0 }
 0x1fc   :  { %v989_v24 = vpop.f32.mrf.mxu1  ;;  %v572_v34 = vadd.f32 %v571_v23, %v492_v22 }
 0x1fd   :  { %v1030_v25 = vpop.f32.mrf.mxu0 }
 0x1fe   :  { %v497_v26 = vpop.f32.mrf.mxu1 }
 0x1ff   :  { %v576_v27 = vpop.f32.mrf.mxu0 }
 0x200   :  { %v992_v28 = vpop.f32.mrf.mxu1 }
 0x201   :  { %v1033_v29 = vpop.f32.mrf.mxu0 }
 0x216   :  { %v665_v31 = vpop.f32.mrf.mxu1 }
 0x217   :  { %v678_v32 = vadd.f32 %v665_v31, %v567_v30 }
 0x218   :  { %v1068_v33 = vpop.f32.mrf.mxu1 }
 0x219   :  { %v687_v35 = vadd.f32 %v714_v0, %v678_v32 }
 0x21a   :  { %v670_v36 = vpop.f32.mrf.mxu1 }
 0x21b   :  { %v689_v37 = vmul.f32 0.5, %v687_v35  ;;  %v679_v38 = vadd.f32 %v670_v36, %v572_v34 }
 0x21c   :  { %v1071_v39 = vpop.f32.mrf.mxu1 }
 0x21d   :  { %v691_v40 = vadd.f32 %v689_v37, %v1243_v15  ;;  %v688_v41 = vadd.f32 %v714_v0, %v679_v38 }
 0x21e   :  { %v675_v42 = vpop.f32.mrf.mxu1 }
 0x21f   :  { %693 = vst [vmem:[#allocation9] sm:$0xff] %v691_v40  ;;  %v690_v43 = vmul.f32 0.5, %v688_v41 }
 0x220   :  { %v1074_v44 = vpop.f32.mrf.mxu1 }
 0x221   :  { %v692_v45 = vadd.f32 %v690_v43, %v1252_v21 }
 0x223   :  { %694 = vst [vmem:[#allocation9 + $0x8] sm:$0xff] %v692_v45 }
 0x224   :  { %1154 = shalt.err (!%p1151_p5)
}
 0x225   :  { %706 = dma.vmem_to_hbm [thread:$0]  %s701_s11, 256, %s1409_s5, [#allocation5], %s1171_s23, %s1171_s23, %s1172_s24  }
 0x226   :  { %1167 = dma.done.wait [#allocation5], 256  }
 0x227   :  { %1168 = vsyncadd [#allocation5], 4294967040 }
 0x228   :  { %710 = vsyncpa [#allocation4], 1 }
 0x229   :  { %711 = vsyncpa [#allocation7], 1 }
 0x22a   :  { %712 = vsyncpa [#allocation5], 1 }

</bundles_post_ra>
